<compile_context>
chip_gen: v7x
topology: tpu7x:2x2x1
jax: 0.10.0
libtpu: 0.0.40
codegen_flags: <defaults>
</compile_context>

<pallas_src>
import functools

import jax
import jax.numpy as jnp
from jax.experimental import pallas as pl
from jax.experimental.pallas import tpu as pltpu


def _cluster_agg_kernel(slab_ref, w1_ref, b1_ref, w2_ref, b2_ref, out_ref, *,
                        tb, n_agents, n_clusters, d, use_fast):
    """One grid step: TB batch elements.

    slab_ref: (TB*N, D+3)  feat dtype: [features | 1 | b_local | cluster_id]
    w1_ref  : (D, H)       feat dtype (pre-cast in wrapper)
    b1_ref  : (1, H) f32
    w2_ref  : (1, H) f32   (second linear applied as a lane reduce)
    b2_ref  : (1, 1) f32   in SMEM
    out_ref : (TB, C*D) f32
    """
    n_cols = tb * n_clusters                       # one column per (cluster, batch)

    x = slab_ref[:, :d]                            # (R, D)   agent features
    xa = slab_ref[:, :d + 1]                       # (R, D+1) features + ones column

    # importance_net: Linear(D, H) on the MXU -> ReLU -> Linear(H, 1) as a
    # lane reduce (frees the MXU; 1-wide matmul wastes 127/255 output cols)
    # -> Sigmoid.  All post-MXU math in f32.
    h = jnp.dot(x, w1_ref[...], preferred_element_type=jnp.float32) + b1_ref[...]
    h = jnp.maximum(h, 0.0)                                        # (R, H) f32
    logit = jnp.sum(h * w2_ref[...], axis=1, keepdims=True) + b2_ref[0, 0]
    imp = jax.nn.sigmoid(logit)                                    # (R, 1) f32

    # imp in (0, 1) -> exp(imp) in (1, e): softmax is unconditionally stable
    # without max subtraction.  EUP work is R elements, not R * n_cols.
    exp_imp = jnp.exp(imp)                                         # (R, 1) f32

    # Target column per agent row: col = cluster*TB + batch_in_block
    # (cluster-major so each cluster's TB output rows are contiguous).
    b_local = slab_ref[:, d + 1:d + 2].astype(jnp.float32).astype(jnp.int32)
    assign = slab_ref[:, d + 2:d + 3].astype(jnp.float32).astype(jnp.int32)
    tgt = assign * tb + b_local                                    # (R, 1) i32

    col_ids = jax.lax.broadcasted_iota(jnp.int32, (1, n_cols), 1)  # (1, n_cols)
    mask = col_ids == tgt                                          # (R, n_cols)
    e = jnp.where(mask, exp_imp, 0.0)                              # (R, n_cols) f32

    # One matmul gives both the un-normalized cluster sums and the softmax
    # denominators (last column of xa is all ones):
    #   y_full[col, 0:D] = sum_r e[r, col] * x[r, :]
    #   y_full[col, D]   = sum_r e[r, col]              (denominator)
    e_d = e.astype(xa.dtype)
    y_full = jax.lax.dot_general(e_d, xa, (((0,), (0,)), ((), ())),
                                 preferred_element_type=jnp.float32)  # (n_cols, D+1)

    denom = y_full[:, d:d + 1]                                     # (n_cols, 1)
    denom = jnp.where(denom > 0.0, denom, 1.0)   # empty cluster -> output stays 0
    if use_fast:
        y = y_full[:, :d] * pl.reciprocal(denom, approx=True)      # EUP slot
    else:
        y = y_full[:, :d] / denom                                  # (n_cols, D) f32

    # Lane-concatenate the C contiguous (TB, D) row groups into one (TB, C*D)
    # slab and store it with a single full-block write.
    pieces = [y[c * tb:(c + 1) * tb, :] for c in range(n_clusters)]
    out_ref[...] = jnp.concatenate(pieces, axis=1).astype(out_ref.dtype)


def _vmem_step_bytes(tb, n, c, d, feat_bytes):
    """Rough per-step VMEM footprint (tiles pad lanes to multiples of 128)."""
    lane = lambda x: ((x + 127) // 128) * 128
    r, n_cols = tb * n, tb * c
    slab = 2 * r * lane(d + 3) * feat_bytes          # double-buffered input slab
    out = 2 * tb * lane(c * d) * 4                   # double-buffered output
    big = 4 * r * lane(n_cols) * 4                   # mask / e / dot operands
    small = 3 * r * lane(max(d // 2, 1)) * 4         # h and friends
    return slab + out + big + small


def _pick_tb(batch, n, c, d, feat_bytes, max_tb=128,
             vmem_budget=12 * 1024 * 1024):
    """Largest power-of-two multiple of 8 that fits the VMEM budget and does
    not exceed the 8-aligned batch.  Small problems -> one fat grid step;
    large problems -> >= 2 steps (keeps both v7x TensorCores fed)."""
    b8 = ((batch + 7) // 8) * 8
    tb = 8
    while (tb * 2 <= max_tb and tb * 2 <= b8
           and _vmem_step_bytes(tb * 2, n, c, d, feat_bytes) <= vmem_budget):
        tb *= 2
    return tb


def cluster_aggregator(features, cluster_assignments, num_clusters, params,
                       *, use_bf16_mxu=True, max_tb=128):
    """weighted_mean ClusterAggregator forward.

    features:            (B, N, D) float
    cluster_assignments: (B, N)    int
    returns:             (B, num_clusters, D) float32
    """
    w1, b1, w2, b2 = params
    B, N, D = features.shape
    H = w1.shape[1]
    C = num_clusters

    feat_dtype = jnp.bfloat16 if use_bf16_mxu else jnp.float32
    feat_bytes = 2 if use_bf16_mxu else 4

    tb = _pick_tb(B, N, C, D, feat_bytes, max_tb=max_tb)
    B_pad = ((B + tb - 1) // tb) * tb
    n_blocks = B_pad // tb

    feats = features.astype(jnp.float32)
    assign = cluster_assignments.astype(jnp.int32)
    if B_pad != B:
        # Padded batches only pollute their own (discarded) output rows.
        feats = jnp.pad(feats, ((0, B_pad - B), (0, 0), (0, 0)))
        assign = jnp.pad(assign, ((0, B_pad - B), (0, 0)))

    # One HBM slab per agent row: [features | 1 | batch_in_block | cluster_id].
    # b_local < tb <= 128 and cluster_id < C are exact in bf16 (integers <= 256).
    ones = jnp.ones((B_pad, N, 1), jnp.float32)
    b_local = (jnp.arange(B_pad, dtype=jnp.int32) % tb).astype(jnp.float32)
    b_local = jnp.broadcast_to(b_local[:, None, None], (B_pad, N, 1))
    slab = jnp.concatenate(
        [feats, ones, b_local, assign.astype(jnp.float32)[..., None]], axis=-1)
    slab = slab.reshape(B_pad * N, D + 3).astype(feat_dtype)

    # Resident weights, pre-cast ONCE (no per-step VPU packs).
    w1_k = jnp.asarray(w1, jnp.float32).astype(feat_dtype)        # (D, H)
    b1_2d = jnp.asarray(b1, jnp.float32).reshape(1, H)            # (1, H) f32
    w2_row = jnp.asarray(w2, jnp.float32).reshape(1, H)           # (1, H) f32
    b2_2d = jnp.asarray(b2, jnp.float32).reshape(1, 1)            # SMEM scalar

    kernel = functools.partial(_cluster_agg_kernel, tb=tb, n_agents=N,
                               n_clusters=C, d=D, use_fast=use_bf16_mxu)

    out_flat = pl.pallas_call(
        kernel,
        out_shape=jax.ShapeDtypeStruct((B_pad, C * D), jnp.float32),
        grid_spec=pltpu.PrefetchScalarGridSpec(
            num_scalar_prefetch=0,
            grid=(n_blocks,),
            in_specs=[
                pl.BlockSpec((tb * N, D + 3), lambda i: (i, 0)),   # agent slab
                pl.BlockSpec((D, H), lambda i: (0, 0)),            # W1 (resident)
                pl.BlockSpec((1, H), lambda i: (0, 0)),            # b1 (resident)
                pl.BlockSpec((1, H), lambda i: (0, 0)),            # W2 row (resident)
                pl.BlockSpec(memory_space=pltpu.MemorySpace.SMEM), # b2 scalar
            ],
            out_specs=pl.BlockSpec((tb, C * D), lambda i: (i, 0)),
        ),
        compiler_params=pltpu.CompilerParams(
            dimension_semantics=("parallel",),
            vmem_limit_bytes=32 * 1024 * 1024),
    )(slab, w1_k, b1_2d, w2_row, b2_2d)

    return out_flat[:B].reshape(B, C, D)


def _reference(features, cluster_assignments, num_clusters, params):
    """Pure-JAX reference matching the PyTorch forward (weighted_mean)."""
    w1, b1, w2, b2 = params
    h = jnp.maximum(features @ w1 + b1, 0.0)
    imp = jax.nn.sigmoid(h @ w2 + b2)                               # (B, N, 1)
    onehot = cluster_assignments[..., None] == jnp.arange(num_clusters)
    m = jnp.max(jnp.where(onehot, imp, -jnp.inf), axis=1, keepdims=True)
    e = jnp.where(onehot, jnp.exp(imp - m), 0.0)
    denom = jnp.sum(e, axis=1, keepdims=True)
    w = e / jnp.where(denom > 0.0, denom, 1.0)
    return jnp.einsum("bnc,bnd->bcd", w, features)


if __name__ == "__main__":
    # Shapes consistent with the module: N=8 agents, D=32 embed_dim (H=16
    # hidden), C=4 clusters.  C*D = 128 -> the single output store per step is
    # fully lane-dense.
    N, D, C = 8, 32, 4
    H = D // 2

    key = jax.random.PRNGKey(0)
    (k_feat, k_assign, k_w1, k_b1, k_w2, k_b2,
     k_feat2, k_assign2) = jax.random.split(key, 8)

    # importance_net parameters (Linear(D, H), Linear(H, 1)).
    w1 = jax.random.normal(k_w1, (D, H), dtype=jnp.float32) * (1.0 / jnp.sqrt(D))
    b1 = jax.random.normal(k_b1, (H,), dtype=jnp.float32) * 0.01
    w2 = jax.random.normal(k_w2, (H, 1), dtype=jnp.float32) * (1.0 / jnp.sqrt(H))
    b2 = jax.random.normal(k_b2, (1,), dtype=jnp.float32) * 0.01
    params = (w1, b1, w2, b2)

    # --- Case 1: B=16 -> single fat grid step (small-problem fast path). ---
    B = 16
    features = jax.random.normal(k_feat, (B, N, D), dtype=jnp.float32)
    cluster_assignments = jax.random.randint(k_assign, (B, N), 0, C,
                                             dtype=jnp.int32)
    ref = _reference(features, cluster_assignments, C, params)

    out_f32 = cluster_aggregator(features, cluster_assignments, C, params,
                                 use_bf16_mxu=False)
    out_f32 = jax.block_until_ready(out_f32)
    assert out_f32.shape == (B, C, D)
    assert jnp.allclose(out_f32, ref, atol=1e-4, rtol=1e-4), \
        "f32 path mismatch vs reference (B=16)"

    out_bf16 = cluster_aggregator(features, cluster_assignments, C, params,
                                  use_bf16_mxu=True)
    out_bf16 = jax.block_until_ready(out_bf16)
    assert jnp.allclose(out_bf16, ref, atol=1e-1, rtol=1e-1), \
        "bf16 path mismatch vs reference (B=16)"

    # --- Case 2: B=20 -> padded batch, 2-step 'parallel' grid. ---
    B2 = 20
    features2 = jax.random.normal(k_feat2, (B2, N, D), dtype=jnp.float32)
    assign2 = jax.random.randint(k_assign2, (B2, N), 0, C, dtype=jnp.int32)
    ref2 = _reference(features2, assign2, C, params)

    out2 = cluster_aggregator(features2, assign2, C, params,
                              use_bf16_mxu=False)
    out2 = jax.block_until_ready(out2)
    assert out2.shape == (B2, C, D)
    assert jnp.allclose(out2, ref2, atol=1e-4, rtol=1e-4), \
        "f32 path mismatch vs reference (B=20, padded multi-step grid)"

    print("KERNEL_OK")
</pallas_src>

<mosaic_0001>
module attributes {stable_mosaic.version = 11 : i64} {
  func.func @_cluster_agg_kernel(%arg0: i32, %arg1: memref<128x35xf32, #tpu.memory_space<vmem>>, %arg2: memref<32x16xf32, #tpu.memory_space<vmem>>, %arg3: memref<1x16xf32, #tpu.memory_space<vmem>>, %arg4: memref<1x16xf32, #tpu.memory_space<vmem>>, %arg5: memref<1x1xf32, #tpu.memory_space<smem>>, %arg6: memref<16x128xf32, #tpu.memory_space<vmem>>) attributes {dimension_semantics = [#tpu.dimension_semantics<parallel>], iteration_bounds = array<i64: 1>, scalar_prefetch = 0 : i64, scratch_operands = 0 : i64, tpu.core_type = #tpu.core_type<tc>, window_params = [{transform_indices = @transform_0, window_bounds = array<i64: 128, 35>}, {pipeline_mode = #tpu.pipeline_mode<synchronous>, transform_indices = @transform_1, window_bounds = array<i64: 32, 16>}, {pipeline_mode = #tpu.pipeline_mode<synchronous>, transform_indices = @transform_2, window_bounds = array<i64: 1, 16>}, {pipeline_mode = #tpu.pipeline_mode<synchronous>, transform_indices = @transform_3, window_bounds = array<i64: 1, 16>}, {transform_indices = @transform_4, window_bounds = array<i64: 1, 1>}, {transform_indices = @transform_5, window_bounds = array<i64: 16, 128>}]} {
    %c0 = arith.constant 0 : index
    %c0_0 = arith.constant 0 : index
    %0 = vector.load %arg1[%c0, %c0_0] : memref<128x35xf32, #tpu.memory_space<vmem>>, vector<128x32xf32>
    %c0_1 = arith.constant 0 : index
    %c0_2 = arith.constant 0 : index
    %1 = vector.load %arg1[%c0_1, %c0_2] : memref<128x35xf32, #tpu.memory_space<vmem>>, vector<128x33xf32>
    %c0_3 = arith.constant 0 : index
    %c0_4 = arith.constant 0 : index
    %2 = vector.load %arg2[%c0_3, %c0_4] : memref<32x16xf32, #tpu.memory_space<vmem>>, vector<32x16xf32>
    %cst = arith.constant dense<0.000000e+00> : vector<128x16xf32>
    %3 = tpu.matmul %0, %2, %cst {dimension_numbers = #tpu.dot_dimension_numbers<[1], [0], [0], [1], [0, 0, 1, 1], [], []>} : vector<128x32xf32>, vector<32x16xf32>, vector<128x16xf32> -> vector<128x16xf32>
    %c0_5 = arith.constant 0 : index
    %c0_6 = arith.constant 0 : index
    %4 = vector.load %arg3[%c0_5, %c0_6] : memref<1x16xf32, #tpu.memory_space<vmem>>, vector<1x16xf32>
    %5 = vector.broadcast %4 : vector<1x16xf32> to vector<128x16xf32>
    %6 = arith.addf %3, %5 : vector<128x16xf32>
    %cst_7 = arith.constant 0.000000e+00 : f32
    %7 = vector.broadcast %cst_7 : f32 to vector<128x16xf32>
    %8 = arith.maximumf %6, %7 : vector<128x16xf32>
    %c0_8 = arith.constant 0 : index
    %c0_9 = arith.constant 0 : index
    %9 = vector.load %arg4[%c0_8, %c0_9] : memref<1x16xf32, #tpu.memory_space<vmem>>, vector<1x16xf32>
    %10 = vector.broadcast %9 : vector<1x16xf32> to vector<128x16xf32>
    %11 = arith.mulf %8, %10 : vector<128x16xf32>
    %cst_10 = arith.constant dense<0.000000e+00> : vector<128xf32>
    %12 = vector.multi_reduction <add>, %11, %cst_10 [1] : vector<128x16xf32> to vector<128xf32>
    %13 = vector.shape_cast %12 : vector<128xf32> to vector<128x1xf32>
    %c0_11 = arith.constant 0 : index
    %c0_12 = arith.constant 0 : index
    %14 = memref.load %arg5[%c0_11, %c0_12] : memref<1x1xf32, #tpu.memory_space<smem>>
    %15 = vector.broadcast %14 : f32 to vector<128x1xf32>
    %16 = arith.addf %13, %15 : vector<128x1xf32>
    %17 = arith.negf %16 : vector<128x1xf32>
    %18 = math.exp %17 : vector<128x1xf32>
    %cst_13 = arith.constant 1.000000e+00 : f32
    %19 = vector.broadcast %cst_13 : f32 to vector<128x1xf32>
    %20 = arith.addf %19, %18 : vector<128x1xf32>
    %21 = arith.divf %19, %20 : vector<128x1xf32>
    %22 = math.exp %21 : vector<128x1xf32>
    %c0_14 = arith.constant 0 : index
    %c33 = arith.constant 33 : index
    %23 = vector.load %arg1[%c0_14, %c33] : memref<128x35xf32, #tpu.memory_space<vmem>>, vector<128x1xf32>
    %24 = arith.fptosi %23 : vector<128x1xf32> to vector<128x1xi32>
    %c0_15 = arith.constant 0 : index
    %c34 = arith.constant 34 : index
    %25 = vector.load %arg1[%c0_15, %c34] : memref<128x35xf32, #tpu.memory_space<vmem>>, vector<128x1xf32>
    %26 = arith.fptosi %25 : vector<128x1xf32> to vector<128x1xi32>
    %c16_i32 = arith.constant 16 : i32
    %27 = vector.broadcast %c16_i32 : i32 to vector<128x1xi32>
    %28 = arith.muli %26, %27 : vector<128x1xi32>
    %29 = arith.addi %28, %24 : vector<128x1xi32>
    %30 = tpu.iota {dimensions = array<i32: 1>} : vector<1x64xi32>
    %31 = vector.broadcast %30 : vector<1x64xi32> to vector<128x64xi32>
    %32 = vector.broadcast %29 : vector<128x1xi32> to vector<128x64xi32>
    %33 = arith.cmpi eq, %31, %32 : vector<128x64xi32>
    %cst_16 = arith.constant 0.000000e+00 : f32
    %34 = vector.shape_cast %22 : vector<128x1xf32> to vector<128x1xf32>
    %35 = vector.broadcast %34 : vector<128x1xf32> to vector<128x64xf32>
    %36 = vector.broadcast %cst_16 : f32 to vector<128x64xf32>
    %37 = arith.select %33, %35, %36 : vector<128x64xi1>, vector<128x64xf32>
    %cst_17 = arith.constant dense<0.000000e+00> : vector<64x33xf32>
    %38 = tpu.matmul %37, %1, %cst_17 {dimension_numbers = #tpu.dot_dimension_numbers<[0], [0], [1], [1], [0, 1, 1, 1], [], []>} : vector<128x64xf32>, vector<128x33xf32>, vector<64x33xf32> -> vector<64x33xf32>
    %39 = vector.extract_strided_slice %38 {offsets = [0, 32], sizes = [64, 1], strides = [1, 1]} : vector<64x33xf32> to vector<64x1xf32>
    %cst_18 = arith.constant 0.000000e+00 : f32
    %40 = vector.broadcast %cst_18 : f32 to vector<64x1xf32>
    %41 = arith.cmpf ogt, %39, %40 : vector<64x1xf32>
    %cst_19 = arith.constant 1.000000e+00 : f32
    %42 = vector.broadcast %cst_19 : f32 to vector<64x1xf32>
    %43 = arith.select %41, %39, %42 : vector<64x1xi1>, vector<64x1xf32>
    %44 = vector.extract_strided_slice %38 {offsets = [0, 0], sizes = [64, 32], strides = [1, 1]} : vector<64x33xf32> to vector<64x32xf32>
    %45 = vector.broadcast %43 : vector<64x1xf32> to vector<64x32xf32>
    %46 = arith.divf %44, %45 : vector<64x32xf32>
    %47 = vector.extract_strided_slice %46 {offsets = [0, 0], sizes = [16, 32], strides = [1, 1]} : vector<64x32xf32> to vector<16x32xf32>
    %48 = vector.extract_strided_slice %46 {offsets = [16, 0], sizes = [16, 32], strides = [1, 1]} : vector<64x32xf32> to vector<16x32xf32>
    %49 = vector.extract_strided_slice %46 {offsets = [32, 0], sizes = [16, 32], strides = [1, 1]} : vector<64x32xf32> to vector<16x32xf32>
    %50 = vector.extract_strided_slice %46 {offsets = [48, 0], sizes = [16, 32], strides = [1, 1]} : vector<64x32xf32> to vector<16x32xf32>
    %51 = tpu.concatenate %47, %48, %49, %50 in 1 : vector<16x32xf32>, vector<16x32xf32>, vector<16x32xf32>, vector<16x32xf32> -> vector<16x128xf32>
    %c0_20 = arith.constant 0 : index
    %c0_21 = arith.constant 0 : index
    %52 = vector.load %arg6[%c0_20, %c0_21] : memref<16x128xf32, #tpu.memory_space<vmem>>, vector<16x128xf32>
    tpu.vector_store %arg6[%c0_20, %c0_21], %51 {strides = array<i32>} : memref<16x128xf32, #tpu.memory_space<vmem>>, vector<16x128xf32>,
    return
  }
  func.func @transform_0(%arg0: i32) -> (i32, i32) {
    %c0_i32 = arith.constant 0 : i32
    %c0_i32_0 = arith.constant 0 : i32
    return %arg0, %c0_i32 : i32, i32
  }
  func.func @transform_1(%arg0: i32) -> (i32, i32) {
    %c0_i32 = arith.constant 0 : i32
    %c0_i32_0 = arith.constant 0 : i32
    %c0_i32_1 = arith.constant 0 : i32
    return %c0_i32, %c0_i32_0 : i32, i32
  }
  func.func @transform_2(%arg0: i32) -> (i32, i32) {
    %c0_i32 = arith.constant 0 : i32
    %c0_i32_0 = arith.constant 0 : i32
    %c0_i32_1 = arith.constant 0 : i32
    return %c0_i32, %c0_i32_0 : i32, i32
  }
  func.func @transform_3(%arg0: i32) -> (i32, i32) {
    %c0_i32 = arith.constant 0 : i32
    %c0_i32_0 = arith.constant 0 : i32
    %c0_i32_1 = arith.constant 0 : i32
    return %c0_i32, %c0_i32_0 : i32, i32
  }
  func.func @transform_4(%arg0: i32) -> (i32, i32) {
    %c0_i32 = arith.constant 0 : i32
    %c0_i32_0 = arith.constant 0 : i32
    %c0_i32_1 = arith.constant 0 : i32
    return %c0_i32, %c0_i32_0 : i32, i32
  }
  func.func @transform_5(%arg0: i32) -> (i32, i32) {
    %c0_i32 = arith.constant 0 : i32
    %c0_i32_0 = arith.constant 0 : i32
    return %arg0, %c0_i32 : i32, i32
  }
}

</mosaic_0001>

<bundles_post_ra>
// kernel: tpu_custom_call.1
= control target key start
LH: loop header
LB: loop body
LE: loop exit
PB: predicated region body
PF: predicated region fallthrough
CT: control target
= control target key end

     0   :  { %vm49_vm0 = vcmask 261120   ;;  %v1289_v7 = vmov 34   ;;  %s1290_s12 = smov 1   ;;  %s1629_s0 = inlined_call_operand.vmem [shape: f32[128,35], index: 0, kind: input, shape index: {}]   ;;  %s1630_s1 = inlined_call_operand.vmem [shape: f32[32,16], index: 1, kind: input, shape index: {}]   ;;  %s1631_s2 = inlined_call_operand.vmem [shape: f32[1,16], index: 2, kind: input, shape index: {}]   ;;  %s1632_s3 = inlined_call_operand.vmem [shape: f32[1,16], index: 3, kind: input, shape index: {}]   ;;  %s1633_s4 = inlined_call_operand.<no memory space> [shape: f32[1,1], index: 4, kind: input, shape index: {}]   ;;  %s1634_s5 = inlined_call_operand.hbm [shape: f32[16,128], index: 5, kind: output, shape index: {}]  }
   0x1   :  { %v38_v0 = vld [vmem:[%s1630_s1] sm:$0xff]  ;;  %v39_v1 = vld [vmem:[%s1630_s1 + $0x8] sm:$0xff]  ;;  %v40_v2 = vld [vmem:[%s1630_s1 + $0x10] sm:$0xff]  ;;  %1149 = vset.pattern.permute.xlu1 %v1289_v7  ;;  %1150 = vset.pattern.permute.xlu0 %v1289_v7 }
   0x2   :  { %v1052_v3 = vpack.c.bf16 %v39_v1, %v38_v0  ;;  %v41_v4 = vld [vmem:[%s1630_s1 + $0x18] sm:$0xff]  ;;  %v22_v5 = vld [vmem:[%s1629_s0] sm:$0xff]  ;;  %v23_v6 = vld [vmem:[%s1629_s0 + $0x8] sm:$0xff] }
   0x3   :  { %v1056_v8 = vpack.c.bf16 %v41_v4, %v40_v2  ;;  %984 = vmatprep.mubr.msk.f32.mxu0 %vm49_vm0, %v22_v5  ;;  %v1060_v9 = vpack.c.bf16 %v23_v6, %v22_v5  ;;  %v24_v10 = vld [vmem:[%s1629_s0 + $0x10] sm:$0xff]  ;;  %v25_v11 = vld [vmem:[%s1629_s0 + $0x18] sm:$0xff]  ;;  %v1108_v12 = vtrunc.f32 %v22_v5  ;;  %v1110_v13 = vtrunc.f32 %v23_v6  ;;  %v26_v18 = vld [vmem:[%s1629_s0 + $0x20] sm:$0xff] }
   0x4   :  { %1053 = vmatprep.subr.bf16.mxu0 %v1052_v3  ;;  %v1112_v14 = vtrunc.f32 %v24_v10  ;;  %v1114_v15 = vtrunc.f32 %v25_v11  ;;  %v1064_v16 = vpack.c.bf16 %v25_v11, %v24_v10  ;;  %v27_v20 = vld [vmem:[%s1629_s0 + $0x28] sm:$0xff]  ;;  %v1116_v22 = vtrunc.f32 %v26_v18 }
   0x5   :  { %1055 = vmatpush3.bf16.msra.mxu0 %v1052_v3  ;;  %v1353_v17 = vcvt.f32.s32 %v1108_v12  ;;  %1092 = vmatprep.subr.bf16.mxu1 %v1060_v9  ;;  %v1365_v21 = vcvt.f32.s32 %v1110_v13 }
   0x6   :  { %1057 = vmatprep.subr.bf16.mxu0 %v1056_v8  ;;  %v1358_v19 = vcvt.f32.s32 %v1112_v14  ;;  %1100 = vmatpush3.bf16.msra.mxu1 %v1060_v9 }
   0x7   :  { %509 = vrot.lane.b32.xlu0 %v1353_v17, %s1290_s12  ;;  %1093 = vmatprep.subr.bf16.mxu1 %v1064_v16 }
   0x8   :  { %11 = vsyncpa [#allocation4], 0  ;;  %513 = vrot.lane.b32.xlu1 %v1358_v19, %s1290_s12  ;;  %v1369_v23 = vcvt.f32.s32 %v1114_v15  ;;  %v1118_v24 = vtrunc.f32 %v27_v20  ;;  %v1068_v25 = vpack.c.bf16 %v27_v20, %v26_v18  ;;  %v28_v26 = vld [vmem:[%s1629_s0 + $0x30] sm:$0xff]  ;;  %v30_v27 = vld [vmem:[%s1629_s0 + $0x40] sm:$0xff]  ;;  %v1379_v28 = vcvt.f32.s32 %v1116_v22  ;;  %s1293_s10 = smov 64   ;;  %s1294_s11 = smov 96  }
   0x9   :  { %1059 = vmatpush3.bf16.msra.mxu0 %v1056_v8  ;;  %v1120_v29 = vtrunc.f32 %v28_v26  ;;  %v29_v30 = vld [vmem:[%s1629_s0 + $0x38] sm:$0xff]  ;;  %v1124_v32 = vtrunc.f32 %v30_v27  ;;  %v31_v37 = vld [vmem:[%s1629_s0 + $0x48] sm:$0xff]  ;;  %v36_v41 = vld [vmem:[%s1629_s0 + $0x70] sm:$0xff]  ;;  %v493_v63 = vmul.u32 16, %v1353_v17  ;;  %vm282_vm1 = vcmask 130048  }
   0xa   :  { %1061 = vmatprep.subr.bf16.mxu0 %v1060_v9  ;;  %1101 = vmatpush3.bf16.msra.mxu1 %v1064_v16  ;;  %v1387_v31 = vcvt.f32.s32 %v1118_v24  ;;  %v1072_v33 = vpack.c.bf16 %v29_v30, %v28_v26  ;;  %v33_v34 = vld [vmem:[%s1629_s0 + $0x58] sm:$0xff]  ;;  %v1122_v36 = vtrunc.f32 %v29_v30  ;;  %v1076_v40 = vpack.c.bf16 %v31_v37, %v30_v27  ;;  %v32_v44 = vld [vmem:[%s1629_s0 + $0x50] sm:$0xff]  ;;  %v34_v50 = vld [vmem:[%s1629_s0 + $0x60] sm:$0xff] }
   0xb   :  { %511 = vrot.lane.b32.xlu0 %v1365_v21, %s1290_s12  ;;  %1094 = vmatprep.subr.bf16.mxu1 %v1068_v25  ;;  %v1395_v35 = vcvt.f32.s32 %v1120_v29  ;;  %v1403_v38 = vcvt.f32.s32 %v1124_v32  ;;  %v1130_v39 = vtrunc.f32 %v33_v34  ;;  %v1126_v43 = vtrunc.f32 %v31_v37  ;;  %v35_v51 = vld [vmem:[%s1629_s0 + $0x68] sm:$0xff]  ;;  %v37_v56 = vld [vmem:[%s1629_s0 + $0x78] sm:$0xff]  ;;  %v1472_v2 = vld [vmem:[%s1631_s2] ss:$0 sm:$0xff] }
   0xc   :  { %985 = vmatmul.mubr.msk.f32.vlgmr.msra.gmra.mrb[0].mxu0 %vm49_vm0, %v23_v6  ;;  %515 = vrot.lane.b32.xlu1 %v1369_v23, %s1290_s12  ;;  %v1411_v42 = vcvt.f32.s32 %v1122_v36  ;;  %v1136_v46 = vtrunc.f32 %v36_v41  ;;  %v1080_v47 = vpack.c.bf16 %v33_v34, %v32_v44  ;;  %v1128_v49 = vtrunc.f32 %v32_v44  ;;  %v1479_v7 = vld [vmem:[%s1632_s3] ss:$0 sm:$0xff] }
   0xd   :  { %987 = vmatprep.mubr.msk.f32.mxu0 %vm49_vm0, %v24_v10  ;;  %1063 = vmatpush3.bf16.msra.mxu0 %v1060_v9  ;;  %v1419_v45 = vcvt.f32.s32 %v1130_v39  ;;  %v1424_v48 = vcvt.f32.s32 %v1126_v43  ;;  %v1084_v53 = vpack.c.bf16 %v35_v51, %v34_v50  ;;  %v1132_v55 = vtrunc.f32 %v34_v50 }
   0xe   :  { %1065 = vmatprep.subr.bf16.mxu0 %v1064_v16  ;;  %1102 = vmatpush3.bf16.msra.mxu1 %v1068_v25  ;;  %v1435_v52 = vcvt.f32.s32 %v1136_v46  ;;  %v1440_v54 = vcvt.f32.s32 %v1128_v49  ;;  %v1088_v57 = vpack.c.bf16 %v37_v56, %v36_v41  ;;  %v1134_v59 = vtrunc.f32 %v35_v51 }
   0xf   :  { %517 = vrot.lane.b32.xlu0 %v1379_v28, %s1290_s12  ;;  %1095 = vmatprep.subr.bf16.mxu1 %v1072_v33  ;;  %v1451_v58 = vcvt.f32.s32 %v1132_v55  ;;  %v1138_v61 = vtrunc.f32 %v37_v56 }
  0x10   :  { %988 = vmatmul.mubr.msk.f32.gmra.mrb[2].mxu0 %vm49_vm0, %v25_v11  ;;  %519 = vrot.lane.b32.xlu1 %v1387_v31, %s1290_s12  ;;  %v1457_v60 = vcvt.f32.s32 %v1134_v59 }
  0x11   :  { %990 = vmatprep.mubr.msk.f32.mxu0 %vm49_vm0, %v26_v18  ;;  %1067 = vmatpush3.bf16.msra.mxu0 %v1064_v16  ;;  %v1463_v62 = vcvt.f32.s32 %v1138_v61 }
  0x12   :  { %1069 = vmatprep.subr.bf16.mxu0 %v1068_v25  ;;  %1103 = vmatpush3.bf16.msra.mxu1 %v1072_v33 }
  0x13   :  { %521 = vrot.lane.b32.xlu0 %v1395_v35, %s1290_s12  ;;  %1096 = vmatprep.subr.bf16.mxu1 %v1076_v40 }
  0x14   :  { %991 = vmatmul.mubr.msk.f32.gmra.mrb[4].mxu0 %vm49_vm0, %v27_v20  ;;  %525 = vrot.lane.b32.xlu1 %v1403_v38, %s1290_s12 }
  0x15   :  { %993 = vmatprep.mubr.msk.f32.mxu0 %vm49_vm0, %v28_v26  ;;  %1071 = vmatpush3.bf16.msra.mxu0 %v1068_v25 }
  0x16   :  { %1073 = vmatprep.subr.bf16.mxu0 %v1072_v33  ;;  %1104 = vmatpush3.bf16.msra.mxu1 %v1076_v40 }
  0x17   :  { %523 = vrot.lane.b32.xlu0 %v1411_v42, %s1290_s12  ;;  %1097 = vmatprep.subr.bf16.mxu1 %v1080_v47 }
  0x18   :  { %994 = vmatmul.mubr.msk.f32.gmra.mrb[6].mxu0 %vm49_vm0, %v29_v30  ;;  %531 = vrot.lane.b32.xlu1 %v1419_v45, %s1290_s12 }
  0x19   :  { %996 = vmatprep.mubr.msk.f32.mxu0 %vm49_vm0, %v30_v27  ;;  %1075 = vmatpush3.bf16.msra.mxu0 %v1072_v33 }
  0x1a   :  { %1077 = vmatprep.subr.bf16.mxu0 %v1076_v40  ;;  %1105 = vmatpush3.bf16.msra.mxu1 %v1080_v47 }
  0x1b   :  { %527 = vrot.lane.b32.xlu0 %v1424_v48, %s1290_s12  ;;  %1098 = vmatprep.subr.bf16.mxu1 %v1084_v53 }
  0x1c   :  { %997 = vmatmul.mubr.msk.f32.gmra.mrb[8].mxu0 %vm49_vm0, %v31_v37  ;;  %537 = vrot.lane.b32.xlu1 %v1435_v52, %s1290_s12 }
  0x1d   :  { %999 = vmatprep.mubr.msk.f32.mxu0 %vm49_vm0, %v32_v44  ;;  %1079 = vmatpush3.bf16.msra.mxu0 %v1076_v40 }
  0x1e   :  { %1081 = vmatprep.subr.bf16.mxu0 %v1080_v47  ;;  %1106 = vmatpush3.bf16.msra.mxu1 %v1084_v53 }
  0x1f   :  { %529 = vrot.lane.b32.xlu0 %v1440_v54, %s1290_s12  ;;  %1099 = vmatprep.subr.bf16.mxu1 %v1088_v57 }
  0x20   :  { %1000 = vmatmul.mubr.msk.f32.gmra.mrb[10].mxu0 %vm49_vm0, %v33_v34 }
  0x21   :  { %1002 = vmatprep.mubr.msk.f32.mxu0 %vm49_vm0, %v34_v50  ;;  %1083 = vmatpush3.bf16.msra.mxu0 %v1080_v47 }
  0x22   :  { %1085 = vmatprep.subr.bf16.mxu0 %v1084_v53  ;;  %1107 = vmatpush3.bf16.msra.mxu1 %v1088_v57 }
  0x23   :  { %533 = vrot.lane.b32.xlu0 %v1451_v58, %s1290_s12 }
  0x24   :  { %1003 = vmatmul.mubr.msk.f32.gmra.mrb[12].mxu0 %vm49_vm0, %v35_v51 }
  0x25   :  { %1005 = vmatprep.mubr.msk.f32.mxu0 %vm49_vm0, %v36_v41  ;;  %1087 = vmatpush3.bf16.msra.mxu0 %v1084_v53 }
  0x26   :  { %1089 = vmatprep.subr.bf16.mxu0 %v1088_v57 }
  0x27   :  { %535 = vrot.lane.b32.xlu0 %v1457_v60, %s1290_s12 }
  0x28   :  { %1006 = vmatmul.mubr.msk.f32.gmra.mrb[14].mxu0 %vm49_vm0, %v37_v56 }
  0x29   :  { %1091 = vmatpush3.bf16.msra.mxu0 %v1088_v57 }
  0x2b   :  { %539 = vrot.lane.b32.xlu0 %v1463_v62, %s1290_s12  ;;  %s1295_s12 = smov [#allocation3]  }
  0x2c   :  { %s887_s13 = sshll.u32 %s1295_s12, 4  ;;  %s888_s13 = int_to_ptr.vmem [resolvable:$true] %s887_s13 }
  0x2d   :  { %s1265_s14 = scalar_lea.vmem %s888_s13, 256  ;;  %p1270_p1 = scmp.lt.s32.totalorder %s888_s13, %s888_s13 }
  0x2e   :  { %p1266_p0 = scmp.ne.s32.totalorder %s888_s13, %s1265_s14  ;;  %p1271_p2 = scmp.lt.s32.totalorder %s1265_s14, %s1265_s14 }
  0x30   :  { %p1272_p3 = por %p1271_p2, %p1270_p1 }
  0x32   :  { %p1273_p4 = pnand %p1272_p3, %p1266_p0 }
  0x79   :  { %v510_v0 = vpop.permute.xlu0 %509 }
  0x7a   :  { %v541_v1 = vadd.s32 %v510_v0, %v493_v63 }
  0x7c   :  { %560 = vperm.xlu1 %1149, %v541_v1  }
  0xdf   :  { %v986_v3 = vpop.f32.mrb[0].mxu0 }
  0xe0   :  { %v170_v4 = vadd.f32 %v986_v3, %v1472_v2  ;;  %v164_v5 = vpop.f32.mrb[1].mxu0 }
  0xe1   :  { %v165_v6 = vadd.f32 %v1472_v2, %v164_v5 }
  0xe2   :  { %v244_v8 = vmax.f32 %v170_v4, 0.0 }
  0xe3   :  { %v243_v9 = vmax.f32 %v165_v6, 0.0  ;;  %v989_v10 = vpop.f32.mrb[2].mxu0 }
  0xe4   :  { %v180_v11 = vadd.f32 %v989_v10, %v1472_v2  ;;  %v174_v12 = vpop.f32.mrb[3].mxu0  ;;  %v267_v13 = vmul.f32 %v1479_v7, %v244_v8  ;;  %v512_v8 = vpop.permute.xlu0 %511 }
  0xe5   :  { %v175_v14 = vadd.f32 %v1472_v2, %v174_v12  ;;  %v266_v15 = vmul.f32 %v1479_v7, %v243_v9 }
  0xe6   :  { %v246_v16 = vmax.f32 %v180_v11, 0.0  ;;  %v286_v17 = vsel %vm282_vm1, %v267_v13, 0.0 }
  0xe7   :  { %v245_v18 = vmax.f32 %v175_v14, 0.0  ;;  %287 = vadd.xlane.f32.xlu0 %v286_v17  ;;  %v992_v20 = vpop.f32.mrb[4].mxu0  ;;  %v283_v22 = vsel %vm282_vm1, %v266_v15, 0.0 }
  0xe8   :  { %v190_v24 = vadd.f32 %v992_v20, %v1472_v2  ;;  %v184_v25 = vpop.f32.mrb[5].mxu0  ;;  %284 = vadd.xlane.f32.xlu1 %v283_v22  ;;  %v269_v26 = vmul.f32 %v1479_v7, %v246_v16 }
  0xe9   :  { %v185_v27 = vadd.f32 %v1472_v2, %v184_v25  ;;  %v268_v29 = vmul.f32 %v1479_v7, %v245_v18 }
  0xea   :  { %v248_v30 = vmax.f32 %v190_v24, 0.0  ;;  %v292_v32 = vsel %vm282_vm1, %v269_v26, 0.0 }
  0xeb   :  { %v247_v33 = vmax.f32 %v185_v27, 0.0  ;;  %v995_v34 = vpop.f32.mrb[6].mxu0  ;;  %v289_v36 = vsel %vm282_vm1, %v268_v29, 0.0  ;;  %v518_v27 = vpop.permute.xlu0 %517 }
  0xec   :  { %v200_v37 = vadd.f32 %v995_v34, %v1472_v2  ;;  %v194_v39 = vpop.f32.mrb[7].mxu0  ;;  %290 = vadd.xlane.f32.xlu0 %v289_v36  ;;  %293 = vadd.xlane.f32.xlu1 %v292_v32  ;;  %v271_v40 = vmul.f32 %v1479_v7, %v248_v30 }
  0xed   :  { %v195_v41 = vadd.f32 %v1472_v2, %v194_v39  ;;  %v270_v44 = vmul.f32 %v1479_v7, %v247_v33 }
  0xee   :  { %v298_v43 = vsel %vm282_vm1, %v271_v40, 0.0  ;;  %v250_v46 = vmax.f32 %v200_v37, 0.0 }
  0xef   :  { %v249_v47 = vmax.f32 %v195_v41, 0.0  ;;  %v998_v49 = vpop.f32.mrb[8].mxu0  ;;  %v295_v56 = vsel %vm282_vm1, %v270_v44, 0.0  ;;  %v522_v44 = vpop.permute.xlu0 %521 }
  0xf0   :  { %v210_v50 = vadd.f32 %v998_v49, %v1472_v2  ;;  %v204_v51 = vpop.f32.mrb[9].mxu0  ;;  %299 = vadd.xlane.f32.xlu0 %v298_v43  ;;  %v273_v0 = vmul.f32 %v1479_v7, %v250_v46 }
  0xf1   :  { %v205_v53 = vadd.f32 %v1472_v2, %v204_v51  ;;  %v272_v55 = vmul.f32 %v1479_v7, %v249_v47  ;;  %v514_v47 = vpop.permute.xlu1 %513 }
  0xf2   :  { %v252_v57 = vmax.f32 %v210_v50, 0.0  ;;  %v304_v10 = vsel %vm282_vm1, %v273_v0, 0.0 }
  0xf3   :  { %v251_v59 = vmax.f32 %v205_v53, 0.0  ;;  %v1001_v61 = vpop.f32.mrb[10].mxu0  ;;  %v301_v63 = vsel %vm282_vm1, %v272_v55, 0.0  ;;  %v524_v50 = vpop.permute.xlu0 %523 }
  0xf4   :  { %v220_v1 = vadd.f32 %v1001_v61, %v1472_v2  ;;  %v214_v3 = vpop.f32.mrb[11].mxu0  ;;  %296 = vadd.xlane.f32.xlu0 %v295_v56  ;;  %302 = vadd.xlane.f32.xlu1 %v301_v63  ;;  %v275_v13 = vmul.f32 %v1479_v7, %v252_v57  ;;  %v495_v56 = vmul.u32 16, %v1358_v19  ;;  %v494_v57 = vmul.u32 16, %v1365_v21 }
  0xf5   :  { %v215_v4 = vadd.f32 %v1472_v2, %v214_v3  ;;  %v274_v5 = vmul.f32 %v1479_v7, %v251_v59  ;;  %v516_v51 = vpop.permute.xlu1 %515 }
  0xf6   :  { %v254_v6 = vmax.f32 %v220_v1, 0.0  ;;  %v310_v22 = vsel %vm282_vm1, %v275_v13, 0.0  ;;  %v543_v63 = vadd.s32 %v514_v47, %v495_v56  ;;  %v542_v0 = vadd.s32 %v512_v8, %v494_v57 }
  0xf7   :  { %v253_v9 = vmax.f32 %v215_v4, 0.0  ;;  %v307_v11 = vsel %vm282_vm1, %v274_v5, 0.0  ;;  %v1004_v12 = vpop.f32.mrb[12].mxu0  ;;  %v528_v55 = vpop.permute.xlu0 %527  ;;  %v503_v1 = vmul.u32 16, %v1440_v54  ;;  %v497_v5 = vmul.u32 16, %v1379_v28 }
  0xf8   :  { %305 = vadd.xlane.f32.xlu0 %v304_v10  ;;  %308 = vadd.xlane.f32.xlu1 %v307_v11  ;;  %v230_v14 = vadd.f32 %v1004_v12, %v1472_v2  ;;  %v224_v15 = vpop.f32.mrb[13].mxu0  ;;  %v277_v16 = vmul.f32 %v1479_v7, %v254_v6  ;;  %v498_v10 = vmul.u32 16, %v1387_v31  ;;  %v499_v28 = vmul.u32 16, %v1395_v35 }
  0xf9   :  { %v225_v20 = vadd.f32 %v1472_v2, %v224_v15  ;;  %v276_v25 = vmul.f32 %v1479_v7, %v253_v9  ;;  %v520_v53 = vpop.permute.xlu1 %519  ;;  %v505_v9 = vmul.u32 16, %v1451_v58  ;;  %v545_v21 = vadd.s32 %v518_v27, %v497_v5 }
  0xfa   :  { %v256_v17 = vmax.f32 %v230_v14, 0.0  ;;  %v316_v18 = vsel %vm282_vm1, %v277_v16, 0.0  ;;  %v546_v54 = vadd.s32 %v520_v53, %v498_v10  ;;  %v547_v58 = vadd.s32 %v522_v44, %v499_v28 }
  0xfb   :  { %v1007_v24 = vpop.f32.mrb[14].mxu0  ;;  %v255_v34 = vmax.f32 %v225_v20, 0.0  ;;  %v313_v36 = vsel %vm282_vm1, %v276_v25, 0.0  ;;  %v530_v61 = vpop.permute.xlu0 %529  ;;  %v500_v13 = vmul.u32 16, %v1411_v42  ;;  %v501_v31 = vmul.u32 16, %v1403_v38 }
  0xfc   :  { %311 = vadd.xlane.f32.xlu0 %v310_v22  ;;  %317 = vadd.xlane.f32.xlu1 %v316_v18  ;;  %v240_v26 = vadd.f32 %v1007_v24, %v1472_v2  ;;  %v234_v29 = vpop.f32.mrb[15].mxu0  ;;  %v279_v30 = vmul.f32 %v1479_v7, %v256_v17  ;;  %v551_v6 = vadd.s32 %v530_v61, %v503_v1  ;;  %v504_v17 = vmul.u32 16, %v1419_v45 }
  0xfd   :  { %v235_v32 = vadd.f32 %v1472_v2, %v234_v29  ;;  %v278_v46 = vmul.f32 %v1479_v7, %v255_v34  ;;  %v526_v59 = vpop.permute.xlu1 %525  ;;  %v548_v14 = vadd.s32 %v524_v50, %v500_v13  ;;  %v506_v35 = vmul.u32 16, %v1457_v60 }
  0xfe   :  { %v258_v33 = vmax.f32 %v240_v26, 0.0  ;;  %v322_v40 = vsel %vm282_vm1, %v279_v30, 0.0  ;;  %v549_v15 = vadd.s32 %v526_v59, %v501_v31  ;;  %v508_v42 = vmul.u32 16, %v1463_v62 }
  0xff   :  { %v257_v37 = vmax.f32 %v235_v32, 0.0  ;;  %v319_v49 = vsel %vm282_vm1, %v278_v46, 0.0  ;;  %v534_v19 = vpop.permute.xlu0 %533 }
 0x100   :  { %314 = vadd.xlane.f32.xlu1 %v313_v36  ;;  %v281_v39 = vmul.f32 %v1479_v7, %v258_v33  ;;  %v553_v11 = vadd.s32 %v534_v19, %v505_v9 }
 0x101   :  { %v280_v41 = vmul.f32 %v1479_v7, %v257_v37  ;;  %v496_v7 = vmul.u32 16, %v1369_v23  ;;  %v532_v3 = vpop.permute.xlu1 %531  ;;  %v507_v23 = vmul.u32 16, %v1435_v52 }
 0x102   :  { %v328_v43 = vsel %vm282_vm1, %v281_v39, 0.0  ;;  %v502_v52 = vmul.u32 16, %v1424_v48  ;;  %v552_v20 = vadd.s32 %v532_v3, %v504_v17  ;;  %v1547_v48 = vstv %s1633_s4  ;;  %s1292_s4 = smov 32  }
 0x103   :  { %329 = vadd.xlane.f32.xlu0 %v328_v43  ;;  %v325_v2 = vsel %vm282_vm1, %v280_v41, 0.0  ;;  %v544_v4 = vadd.s32 %v516_v51, %v496_v7  ;;  %v536_v18 = vpop.permute.xlu0 %535 }
 0x104   :  { %323 = vadd.xlane.f32.xlu1 %v322_v40  ;;  %v550_v16 = vadd.s32 %v528_v55, %v502_v52  ;;  %v554_v22 = vadd.s32 %v536_v18, %v506_v35 }
 0x105   :  { %v538_v8 = vpop.permute.xlu1 %537 }
 0x106   :  { %v555_v12 = vadd.s32 %v538_v8, %v507_v23  ;;  %v557_v8 = vlaneseq }
 0x107   :  { %v540_v24 = vpop.permute.xlu0 %539 }
 0x108   :  { %320 = vadd.xlane.f32.xlu1 %v319_v49  ;;  %v556_v38 = vadd.s32 %v540_v24, %v508_v42 }
 0x109   :  { %v1542_v25 = vpop.permute.xlu1 %560 }
 0x119   :  { %566 = vperm.xlu1 %1149, %v543_v63   ;;  %563 = vperm.xlu0 %1150, %v542_v0  }
 0x11d   :  { %569 = vperm.xlu1 %1149, %v544_v4   ;;  %590 = vperm.xlu0 %1150, %v551_v6  }
 0x121   :  { %572 = vperm.xlu1 %1149, %v545_v21   ;;  %596 = vperm.xlu0 %1150, %v553_v11  }
 0x125   :  { %575 = vperm.xlu1 %1149, %v546_v54   ;;  %602 = vperm.xlu0 %1150, %v555_v12  }
 0x149   :  { %326 = vadd.xlane.f32.xlu1 %v325_v2 }
 0x15a   :  { %578 = vperm.xlu1 %1149, %v547_v58   ;;  %v1569_v58 = vand.u32 127, %v557_v8 }
 0x15c   :  { %vm607_vm2 = vcmp.eq.s32.totalorder %v1569_v58, %v1542_v25 }
 0x15e   :  { %581 = vperm.xlu1 %1149, %v548_v14  }
 0x162   :  { %584 = vperm.xlu1 %1149, %v549_v15  }
 0x166   :  { %587 = vperm.xlu1 %1149, %v550_v16  }
 0x16a   :  { %593 = vperm.xlu1 %1149, %v552_v20  }
 0x16e   :  { %599 = vperm.xlu1 %1149, %v554_v22  }
 0x172   :  { %605 = vperm.xlu1 %1149, %v556_v38  }
 0x174   :  { %v288_v45 = vpop.xlane.xlu0 %287 }
 0x175   :  { %v334_v26 = vadd.f32 %v1547_v48, %v288_v45  ;;  %v285_v27 = vpop.xlane.xlu1 %284 }
 0x176   :  { %v333_v60 = vadd.f32 %v1547_v48, %v285_v27 }
 0x177   :  { %v917_v29 = vmul.f32 -1.442695, %v334_v26 }
 0x178   :  { %v916_v30 = vmul.f32 -1.442695, %v333_v60 }
 0x179   :  { %1153 = vpow2.f32 %v917_v29  ;;  %v291_v62 = vpop.xlane.xlu0 %290  ;;  %v294_v32 = vpop.xlane.xlu1 %293 }
 0x17a   :  { %1155 = vpow2.f32 %v916_v30  ;;  %v335_v33 = vadd.f32 %v1547_v48, %v291_v62  ;;  %v336_v34 = vadd.f32 %v1547_v48, %v294_v32 }
 0x17c   :  { %v918_v36 = vmul.f32 -1.442695, %v335_v33  ;;  %v919_v37 = vmul.f32 -1.442695, %v336_v34 }
 0x17d   :  { %v300_v39 = vpop.xlane.xlu0 %299 }
 0x17e   :  { %1157 = vpow2.f32 %v918_v36  ;;  %v338_v40 = vadd.f32 %v1547_v48, %v300_v39 }
 0x17f   :  { %1159 = vpow2.f32 %v919_v37 }
 0x180   :  { %v921_v41 = vmul.f32 -1.442695, %v338_v40 }
 0x181   :  { %v297_v43 = vpop.xlane.xlu0 %296  ;;  %v1554_v44 = vpop.xlane.xlu1 %302 }
 0x182   :  { %1161 = vpow2.f32 %v921_v41  ;;  %v337_v46 = vadd.f32 %v1547_v48, %v297_v43  ;;  %v339_v38 = vadd.f32 %v1547_v48, %v1554_v44 }
 0x183   :  { %v1154_v2 = vpop.eup %1153 }
 0x184   :  { %v1156_v47 = vpop.eup %1155  ;;  %v398_v49 = vadd.f32 1.0, %v1154_v2  ;;  %v920_v50 = vmul.f32 -1.442695, %v337_v46  ;;  %v922_v27 = vmul.f32 -1.442695, %v339_v38 }
 0x185   :  { %v397_v51 = vadd.f32 1.0, %v1156_v47  ;;  %v1557_v53 = vpop.xlane.xlu1 %308  ;;  %v306_v7 = vpop.xlane.xlu0 %305 }
 0x186   :  { %1163 = vrcp.f32 %v398_v49  ;;  %v340_v60 = vadd.f32 %v1547_v48, %v306_v7  ;;  %v341_v33 = vadd.f32 %v1547_v48, %v1557_v53 }
 0x187   :  { %1165 = vrcp.f32 %v397_v51 }
 0x188   :  { %v1158_v55 = vpop.eup %1157  ;;  %1167 = vpow2.f32 %v920_v50  ;;  %v923_v32 = vmul.f32 -1.442695, %v340_v60  ;;  %v924_v37 = vmul.f32 -1.442695, %v341_v33 }
 0x189   :  { %v1160_v56 = vpop.eup %1159  ;;  %v399_v57 = vadd.f32 1.0, %v1158_v55  ;;  %v1559_v59 = vpop.xlane.xlu1 %317 }
 0x18a   :  { %v400_v61 = vadd.f32 1.0, %v1160_v56  ;;  %v312_v10 = vpop.xlane.xlu0 %311  ;;  %v344_v2 = vadd.f32 %v1547_v48, %v1559_v59 }
 0x18b   :  { %1169 = vrcp.f32 %v399_v57  ;;  %v342_v39 = vadd.f32 %v1547_v48, %v312_v10 }
 0x18c   :  { %v1162_v63 = vpop.eup %1161  ;;  %1171 = vrcp.f32 %v400_v61  ;;  %v927_v51 = vmul.f32 -1.442695, %v344_v2 }
 0x18d   :  { %v1561_v0 = vpop.xlane.xlu1 %314  ;;  %v402_v1 = vadd.f32 1.0, %v1162_v63  ;;  %v925_v43 = vmul.f32 -1.442695, %v342_v39 }
 0x18e   :  { %v343_v41 = vadd.f32 %v1547_v48, %v1561_v0 }
 0x18f   :  { %1173 = vrcp.f32 %v402_v1 }
 0x190   :  { %v1164_v3 = vpop.eup %1163  ;;  %v1567_v28 = vpop.xlane.xlu0 %329  ;;  %v926_v46 = vmul.f32 -1.442695, %v343_v41 }
 0x191   :  { %v1166_v4 = vpop.eup %1165  ;;  %v1563_v5 = vpop.xlane.xlu1 %323  ;;  %v447_v9 = vmul.f32 1.442695, %v1164_v3 }
 0x192   :  { %v1168_v6 = vpop.eup %1167  ;;  %v445_v19 = vmul.f32 1.442695, %v1166_v4  ;;  %v346_v57 = vadd.f32 %v1547_v48, %v1563_v5 }
 0x193   :  { %v401_v21 = vadd.f32 1.0, %v1168_v6  ;;  %v348_v6 = vadd.f32 %v1547_v48, %v1567_v28 }
 0x194   :  { %1175 = vpow2.f32 %v445_v19  ;;  %v929_v7 = vmul.f32 -1.442695, %v346_v57 }
 0x195   :  { %v1170_v11 = vpop.eup %1169  ;;  %1177 = vrcp.f32 %v401_v21  ;;  %v1565_v23 = vpop.xlane.xlu1 %320  ;;  %v931_v10 = vmul.f32 -1.442695, %v348_v6 }
 0x196   :  { %1179 = vpow2.f32 %v447_v9  ;;  %v449_v54 = vmul.f32 1.442695, %v1170_v11  ;;  %v1172_v12 = vpop.eup %1171  ;;  %v345_v50 = vadd.f32 %v1547_v48, %v1565_v23 }
 0x197   :  { %v451_v13 = vmul.f32 1.442695, %v1172_v12 }
 0x198   :  { %1181 = vpow2.f32 %v449_v54  ;;  %v564_v52 = vpop.permute.xlu0 %563  ;;  %v928_v56 = vmul.f32 -1.442695, %v345_v50 }
 0x199   :  { %v567_v14 = vpop.permute.xlu1 %566  ;;  %v1174_v31 = vpop.eup %1173  ;;  %1183 = vpow2.f32 %v451_v13  ;;  %vm608_vm3 = vcmp.eq.s32.totalorder %v1569_v58, %v564_v52 }
 0x19a   :  { %v455_v22 = vmul.f32 1.442695, %v1174_v31  ;;  %vm609_vm4 = vcmp.eq.s32.totalorder %v1569_v58, %v567_v14 }
 0x19d   :  { %v570_v35 = vpop.permute.xlu1 %569 }
 0x19e   :  { %v1176_v15 = vpop.eup %1175  ;;  %vm610_vm5 = vcmp.eq.s32.totalorder %v1569_v58, %v570_v35 }
 0x19f   :  { %v1178_v16 = vpop.eup %1177  ;;  %v623_v17 = vsel %vm607_vm2, %v1176_v15, 0.0 }
 0x1a0   :  { %v1180_v18 = vpop.eup %1179  ;;  %v453_v20 = vmul.f32 1.442695, %v1178_v16  ;;  %639 = vxpose.xlu0.b32.start [1/16] (narrow) %v623_v17, 64 }
 0x1a1   :  { %v624_v42 = vsel %vm608_vm3, %v1180_v18, 0.0  ;;  %v573_v45 = vpop.permute.xlu1 %572 }
 0x1a2   :  { %1185 = vpow2.f32 %v453_v20  ;;  %v1182_v24 = vpop.eup %1181  ;;  %vm611_vm6 = vcmp.eq.s32.totalorder %v1569_v58, %v573_v45 }
 0x1a3   :  { %1187 = vpow2.f32 %v455_v22  ;;  %v625_v25 = vsel %vm609_vm4, %v1182_v24, 0.0  ;;  %v1184_v26 = vpop.eup %1183 }
 0x1a4   :  { %640 = vxpose.xlu0.b32.cont [2/16] (narrow) %v624_v42, 64  ;;  %v626_v29 = vsel %vm610_vm5, %v1184_v26, 0.0  ;;  %1189 = vpow2.f32 %v922_v27 }
 0x1a5   :  { %v576_v62 = vpop.permute.xlu1 %575  ;;  %1191 = vpow2.f32 %v923_v32 }
 0x1a6   :  { %vm612_vm7 = vcmp.eq.s32.totalorder %v1569_v58, %v576_v62  ;;  %1193 = vpow2.f32 %v924_v37  ;;  %v591_v37 = vpop.permute.xlu0 %590 }
 0x1a7   :  { %1195 = vpow2.f32 %v925_v43  ;;  %vm617_vm12 = vcmp.eq.s32.totalorder %v1569_v58, %v591_v37 }
 0x1a8   :  { %641 = vxpose.xlu0.b32.cont [3/16] (narrow) %v625_v25, 64  ;;  %1197 = vpow2.f32 %v926_v46 }
 0x1ac   :  { %v1186_v30 = vpop.eup %1185  ;;  %642 = vxpose.xlu0.b32.cont [4/16] (narrow) %v626_v29, 64 }
 0x1ad   :  { %v627_v34 = vsel %vm611_vm6, %v1186_v30, 0.0  ;;  %v1188_v36 = vpop.eup %1187 }
 0x1ae   :  { %v628_v40 = vsel %vm612_vm7, %v1188_v36, 0.0  ;;  %v1190_v44 = vpop.eup %1189 }
 0x1af   :  { %v403_v47 = vadd.f32 1.0, %v1190_v44  ;;  %v1192_v49 = vpop.eup %1191 }
 0x1b0   :  { %643 = vxpose.xlu0.b32.cont [5/16] (narrow) %v627_v34, 64  ;;  %v404_v53 = vadd.f32 1.0, %v1192_v49  ;;  %v1194_v55 = vpop.eup %1193 }
 0x1b1   :  { %1199 = vrcp.f32 %v403_v47  ;;  %v405_v61 = vadd.f32 1.0, %v1194_v55  ;;  %v1196_v63 = vpop.eup %1195  ;;  %v597_v47 = vpop.permute.xlu0 %596 }
 0x1b2   :  { %1201 = vpow2.f32 %v927_v51  ;;  %v1198_v59 = vpop.eup %1197  ;;  %v406_v0 = vadd.f32 1.0, %v1196_v63  ;;  %vm619_vm14 = vcmp.eq.s32.totalorder %v1569_v58, %v597_v47 }
 0x1b3   :  { %1203 = vrcp.f32 %v404_v53  ;;  %v407_v3 = vadd.f32 1.0, %v1198_v59 }
 0x1b4   :  { %644 = vxpose.xlu0.b32.cont [6/16] (narrow) %v628_v40, 64  ;;  %1205 = vpow2.f32 %v928_v56 }
 0x1b5   :  { %1207 = vrcp.f32 %v405_v61  ;;  %v603_v59 = vpop.permute.xlu0 %602 }
 0x1b6   :  { %1209 = vpow2.f32 %v929_v7  ;;  %vm621_vm1 = vcmp.eq.s32.totalorder %v1569_v58, %v603_v59 }
 0x1b7   :  { %1211 = vrcp.f32 %v406_v0 }
 0x1b8   :  { %1213 = vrcp.f32 %v407_v3 }
 0x1bb   :  { %v1200_v1 = vpop.eup %1199 }
 0x1bc   :  { %v1202_v4 = vpop.eup %1201  ;;  %v457_v9 = vmul.f32 1.442695, %v1200_v1 }
 0x1bd   :  { %v1204_v19 = vpop.eup %1203  ;;  %v408_v21 = vadd.f32 1.0, %v1202_v4 }
 0x1be   :  { %v1206_v5 = vpop.eup %1205  ;;  %1215 = vpow2.f32 %v457_v9  ;;  %v459_v11 = vmul.f32 1.442695, %v1204_v19 }
 0x1bf   :  { %v1208_v23 = vpop.eup %1207  ;;  %v409_v8 = vadd.f32 1.0, %v1206_v5  ;;  %1217 = vrcp.f32 %v408_v21 }
 0x1c0   :  { %1219 = vpow2.f32 %v931_v10  ;;  %v1210_v54 = vpop.eup %1209  ;;  %v461_v12 = vmul.f32 1.442695, %v1208_v23 }
 0x1c1   :  { %1221 = vpow2.f32 %v459_v11  ;;  %v1212_v13 = vpop.eup %1211  ;;  %v410_v52 = vadd.f32 1.0, %v1210_v54 }
 0x1c2   :  { %1223 = vrcp.f32 %v409_v8  ;;  %v1214_v31 = vpop.eup %1213  ;;  %v463_v15 = vmul.f32 1.442695, %v1212_v13 }
 0x1c3   :  { %1225 = vpow2.f32 %v461_v12  ;;  %v465_v20 = vmul.f32 1.442695, %v1214_v31 }
 0x1c8   :  { %v1216_v18 = vpop.eup %1215 }
 0x1c9   :  { %v1218_v22 = vpop.eup %1217 }
 0x1ca   :  { %v1220_v42 = vpop.eup %1219  ;;  %v467_v45 = vmul.f32 1.442695, %v1218_v22 }
 0x1cb   :  { %v1222_v38 = vpop.eup %1221  ;;  %v412_v26 = vadd.f32 1.0, %v1220_v42 }
 0x1d6   :  { %v327_v14 = vpop.xlane.xlu1 %326 }
 0x1d7   :  { %v347_v28 = vadd.f32 %v1547_v48, %v327_v14  ;;  %v1224_v48 = vpop.eup %1223 }
 0x1d8   :  { %v1226_v60 = vpop.eup %1225  ;;  %v469_v29 = vmul.f32 1.442695, %v1224_v48 }
 0x1d9   :  { %v930_v16 = vmul.f32 -1.442695, %v347_v28 }
 0x1da   :  { %v579_v17 = vpop.permute.xlu1 %578 }
 0x1db   :  { %1227 = vpow2.f32 %v930_v16  ;;  %vm613_vm8 = vcmp.eq.s32.totalorder %v1569_v58, %v579_v17 }
 0x1dc   :  { %1229 = vrcp.f32 %v410_v52  ;;  %v629_v35 = vsel %vm613_vm8, %v1216_v18, 0.0 }
 0x1dd   :  { %1231 = vpow2.f32 %v463_v15  ;;  %645 = vxpose.xlu0.b32.cont [7/16] (narrow) %v629_v35, 64 }
 0x1de   :  { %v582_v24 = vpop.permute.xlu1 %581  ;;  %1233 = vpow2.f32 %v465_v20 }
 0x1df   :  { %vm614_vm9 = vcmp.eq.s32.totalorder %v1569_v58, %v582_v24  ;;  %1235 = vpow2.f32 %v467_v45 }
 0x1e0   :  { %v630_v25 = vsel %vm614_vm9, %v1222_v38, 0.0  ;;  %1237 = vrcp.f32 %v412_v26 }
 0x1e1   :  { %646 = vxpose.xlu0.b32.cont [8/16] (narrow) %v630_v25, 64  ;;  %1239 = vpow2.f32 %v469_v29 }
 0x1e2   :  { %v585_v27 = vpop.permute.xlu1 %584 }
 0x1e3   :  { %vm615_vm10 = vcmp.eq.s32.totalorder %v1569_v58, %v585_v27 }
 0x1e4   :  { %v631_v30 = vsel %vm615_vm10, %v1226_v60, 0.0 }
 0x1e5   :  { %v1228_v62 = vpop.eup %1227  ;;  %647 = vxpose.xlu0.b32.cont [9/16] (narrow) %v631_v30, 64 }
 0x1e6   :  { %v1230_v32 = vpop.eup %1229  ;;  %v411_v33 = vadd.f32 1.0, %v1228_v62  ;;  %v588_v34 = vpop.permute.xlu1 %587 }
 0x1e7   :  { %v1232_v36 = vpop.eup %1231  ;;  %vm616_vm11 = vcmp.eq.s32.totalorder %v1569_v58, %v588_v34  ;;  %v471_v41 = vmul.f32 1.442695, %v1230_v32 }
 0x1e8   :  { %1241 = vrcp.f32 %v411_v33  ;;  %v632_v39 = vsel %vm616_vm11, %v1232_v36, 0.0  ;;  %v1234_v40 = vpop.eup %1233  ;;  %vm877_vm11 = vcmask 785408  }
 0x1e9   :  { %648 = vxpose.xlu0.b32.cont [10/16] (narrow) %v632_v39, 64  ;;  %v633_v44 = vsel %vm617_vm12, %v1234_v40, 0.0  ;;  %1243 = vpow2.f32 %v471_v41  ;;  %v1236_v46 = vpop.eup %1235  ;;  %vm874_vm12 = vcmask 523264  }
 0x1ea   :  { %v594_v43 = vpop.permute.xlu1 %593  ;;  %v1238_v2 = vpop.eup %1237 }
 0x1eb   :  { %vm618_vm13 = vcmp.eq.s32.totalorder %v1569_v58, %v594_v43  ;;  %v1240_v50 = vpop.eup %1239  ;;  %v475_v57 = vmul.f32 1.442695, %v1238_v2 }
 0x1ec   :  { %v634_v49 = vsel %vm618_vm13, %v1236_v46, 0.0  ;;  %v635_v56 = vsel %vm619_vm14, %v1240_v50, 0.0 }
 0x1ed   :  { %649 = vxpose.xlu0.b32.cont [11/16] (narrow) %v633_v44, 64 }
 0x1ee   :  { %v600_v53 = vpop.permute.xlu1 %599 }
 0x1ef   :  { %vm620_vm15 = vcmp.eq.s32.totalorder %v1569_v58, %v600_v53 }
 0x1f1   :  { %650 = vxpose.xlu0.b32.cont [12/16] (narrow) %v634_v49, 64 }
 0x1f2   :  { %v1242_v51 = vpop.eup %1241  ;;  %v606_v7 = vpop.permute.xlu1 %605 }
 0x1f3   :  { %v473_v55 = vmul.f32 1.442695, %v1242_v51  ;;  %v1244_v61 = vpop.eup %1243  ;;  %vm622_vm2 = vcmp.eq.s32.totalorder %v1569_v58, %v606_v7  ;;  %v1291_v58 = vmov 32  }
 0x1f4   :  { %v636_v63 = vsel %vm620_vm15, %v1244_v61, 0.0  ;;  %1151 = vset.pattern.permute.xlu1 %v1291_v58 }
 0x1f5   :  { %1245 = vpow2.f32 %v473_v55  ;;  %651 = vxpose.xlu0.b32.cont [13/16] (narrow) %v635_v56, 64 }
 0x1f6   :  { %1247 = vpow2.f32 %v475_v57 }
 0x1f9   :  { %652 = vxpose.xlu0.b32.cont [14/16] (narrow) %v636_v63, 64 }
 0x1ff   :  { %v1246_v0 = vpop.eup %1245 }
 0x200   :  { %v637_v1 = vsel %vm621_vm1, %v1246_v0, 0.0  ;;  %v1248_v3 = vpop.eup %1247 }
 0x201   :  { %653 = vxpose.xlu0.b32.cont [15/16] (narrow) %v637_v1, 64  ;;  %v638_v4 = vsel %vm622_vm2, %v1248_v3, 0.0 }
 0x205   :  { %654 = vxpose.xlu0.b32.end [16/16] (narrow) %v638_v4, 64 }
 0x22e   :  { %1152 = vset.pattern.permute.xlu0 %v1291_v58 }
 0x249   :  { %v655_v6 = vpop.trf.xlu0 }
 0x24a   :  { %1040 = vmatprep.mubr.f32.mxu0 %v655_v6 }
 0x24d   :  { %v656_v9 = vpop.trf.xlu0 }
 0x24e   :  { %1041 = vmatmul.mubr.f32.vlgmr.msra.gmra.mrb[16].mxu0 %v656_v9 }
 0x251   :  { %v657_v19 = vpop.trf.xlu0 }
 0x252   :  { %1043 = vmatprep.mubr.f32.mxu1 %v657_v19 }
 0x255   :  { %v658_v5 = vpop.trf.xlu0 }
 0x256   :  { %1044 = vmatmul.mubr.f32.vlgmr.msra.gmra.mrb[0].mxu1 %v658_v5 }
 0x259   :  { %v659_v21 = vpop.trf.xlu0 }
 0x25a   :  { %1046 = vmatprep.mubr.f32.mxu1 %v659_v21 }
 0x25d   :  { %v660_v10 = vpop.trf.xlu0 }
 0x25e   :  { %1047 = vmatmul.mubr.f32.gmra.mrb[2].mxu1 %v660_v10 }
 0x261   :  { %v661_v11 = vpop.trf.xlu0 }
 0x262   :  { %1049 = vmatprep.mubr.f32.mxu1 %v661_v11 }
 0x265   :  { %v662_v23 = vpop.trf.xlu0 }
 0x266   :  { %1050 = vmatmul.mubr.f32.gmra.mrb[4].mxu1 %v662_v23 }
 0x321   :  { %v1605_v8 = vpop.f32.mrb[16].mxu0 }
 0x322   :  { %v1607_v54 = vpop.f32.mrb[17].mxu0  ;;  %vm777_vm10 = vcmp.gt.f32.partialorder %v1605_v8, 0.0 }
 0x323   :  { %vm776_vm9 = vcmp.gt.f32.partialorder %v1607_v54, 0.0  ;;  %v785_v42 = vsel %vm777_vm10, %v1605_v8, 1.0 }
 0x324   :  { %v784_v22 = vsel %vm776_vm9, %v1607_v54, 1.0 }
 0x329   :  { %v1045_v12 = vpop.f32.mrb[0].mxu1 }
 0x32a   :  { %v747_v13 = vpop.f32.mrb[1].mxu1  ;;  %vm779_vm3 = vcmp.gt.f32.partialorder %v1045_v12, 0.0 }
 0x32b   :  { %v787_v14 = vsel %vm779_vm3, %v1045_v12, 1.0  ;;  %vm778_vm4 = vcmp.gt.f32.partialorder %v747_v13, 0.0 }
 0x32c   :  { %809 = vperm.xlu1 %1151, %v787_v14   ;;  %v786_v28 = vsel %vm778_vm4, %v747_v13, 1.0 }
 0x330   :  { %804 = vperm.xlu1 %1151, %v786_v28  }
 0x331   :  { %v1048_v31 = vpop.f32.mrb[2].mxu1 }
 0x332   :  { %v757_v52 = vpop.f32.mrb[3].mxu1  ;;  %vm781_vm5 = vcmp.gt.f32.partialorder %v1048_v31, 0.0 }
 0x333   :  { %v789_v15 = vsel %vm781_vm5, %v1048_v31, 1.0  ;;  %vm780_vm6 = vcmp.gt.f32.partialorder %v757_v52, 0.0 }
 0x334   :  { %819 = vperm.xlu1 %1151, %v789_v15   ;;  %v788_v16 = vsel %vm780_vm6, %v757_v52, 1.0 }
 0x338   :  { %814 = vperm.xlu1 %1151, %v788_v16  }
 0x339   :  { %v1051_v17 = vpop.f32.mrb[4].mxu1 }
 0x33a   :  { %v767_v18 = vpop.f32.mrb[5].mxu1  ;;  %vm783_vm8 = vcmp.gt.f32.partialorder %v1051_v17, 0.0 }
 0x33b   :  { %vm782_vm7 = vcmp.gt.f32.partialorder %v767_v18, 0.0  ;;  %v791_v35 = vsel %vm783_vm8, %v1051_v17, 1.0 }
 0x33c   :  { %v790_v20 = vsel %vm782_vm7, %v767_v18, 1.0 }
 0x33d   :  { %824 = vperm.xlu1 %1151, %v790_v20  }
 0x341   :  { %829 = vperm.xlu1 %1151, %v791_v35  }
 0x345   :  { %794 = vperm.xlu1 %1151, %v784_v22  }
 0x349   :  { %799 = vperm.xlu1 %1151, %v785_v42  }
 0x3ab   :  { %v810_v24 = vpop.permute.xlu1 %809 }
 0x3ac   :  { %1249 = vrcp.f32 %v810_v24 }
 0x3af   :  { %v805_v38 = vpop.permute.xlu1 %804 }
 0x3b0   :  { %1251 = vrcp.f32 %v805_v38 }
 0x3b3   :  { %v820_v48 = vpop.permute.xlu1 %819 }
 0x3b4   :  { %1253 = vrcp.f32 %v820_v48 }
 0x3b6   :  { %v1250_v25 = vpop.eup %1249 }
 0x3b7   :  { %v815_v45 = vpop.permute.xlu1 %814  ;;  %v839_v26 = vmul.f32 %v1250_v25, %v1045_v12 }
 0x3b8   :  { %1255 = vrcp.f32 %v815_v45 }
 0x3b9   :  { %852 = vrot.lane.b32.xlu1 %v839_v26, %s1292_s4 }
 0x3ba   :  { %v1252_v27 = vpop.eup %1251 }
 0x3bb   :  { %v837_v60 = vmul.f32 %v1252_v27, %v747_v13 }
 0x3bc   :  { %v825_v29 = vpop.permute.xlu1 %824 }
 0x3bd   :  { %1257 = vrcp.f32 %v825_v29  ;;  %850 = vrot.lane.b32.xlu1 %v837_v60, %s1292_s4 }
 0x3be   :  { %v1254_v30 = vpop.eup %1253 }
 0x3bf   :  { %v843_v62 = vmul.f32 %v1254_v30, %v1048_v31 }
 0x3c0   :  { %v830_v32 = vpop.permute.xlu1 %829 }
 0x3c1   :  { %1259 = vrcp.f32 %v830_v32  ;;  %860 = vrot.lane.b32.xlu1 %v843_v62, %s1293_s10 }
 0x3c2   :  { %v1256_v33 = vpop.eup %1255 }
 0x3c3   :  { %v841_v34 = vmul.f32 %v1256_v33, %v757_v52 }
 0x3c4   :  { %v795_v41 = vpop.permute.xlu1 %794 }
 0x3c5   :  { %858 = vrot.lane.b32.xlu1 %v841_v34, %s1293_s10  ;;  %1261 = vrcp.f32 %v795_v41 }
 0x3c7   :  { %v1258_v36 = vpop.eup %1257 }
 0x3c8   :  { %v845_v37 = vmul.f32 %v1258_v36, %v767_v18  ;;  %v800_v43 = vpop.permute.xlu1 %799 }
 0x3c9   :  { %1263 = vrcp.f32 %v800_v43 }
 0x3ca   :  { %866 = vrot.lane.b32.xlu1 %v845_v37, %s1294_s11 }
 0x3cb   :  { %v1260_v39 = vpop.eup %1259 }
 0x3cc   :  { %v847_v40 = vmul.f32 %v1260_v39, %v1051_v17 }
 0x3ce   :  { %868 = vrot.lane.b32.xlu1 %v847_v40, %s1294_s11 }
 0x3cf   :  { %v1262_v47 = vpop.eup %1261 }
 0x3d0   :  { %v833_v50 = vmul.f32 %v1262_v47, %v1607_v54 }
 0x3d3   :  { %v1264_v51 = vpop.eup %1263 }
 0x3d4   :  { %v835_v57 = vmul.f32 %v1264_v51, %v1605_v8 }
 0x42b   :  { %v853_v44 = vpop.permute.xlu1 %852 }
 0x42c   :  { %v873_v63 = vsel %vm49_vm0, %v835_v57, %v853_v44 }
 0x42f   :  { %v851_v46 = vpop.permute.xlu1 %850 }
 0x430   :  { %v872_v53 = vsel %vm49_vm0, %v833_v50, %v851_v46 }
 0x433   :  { %v861_v2 = vpop.permute.xlu1 %860 }
 0x434   :  { %v876_v59 = vsel %vm874_vm12, %v873_v63, %v861_v2 }
 0x437   :  { %v859_v49 = vpop.permute.xlu1 %858 }
 0x438   :  { %v875_v55 = vsel %vm874_vm12, %v872_v53, %v859_v49 }
 0x43c   :  { %v867_v56 = vpop.permute.xlu1 %866 }
 0x43d   :  { %v878_v61 = vsel %vm877_vm11, %v875_v55, %v867_v56 }
 0x43e   :  { %880 = vst [vmem:[#allocation3] sm:$0xff] %v878_v61 }
 0x440   :  { %v869_v7 = vpop.permute.xlu1 %868 }
 0x441   :  { %v879_v0 = vsel %vm877_vm11, %v876_v59, %v869_v7 }
 0x442   :  { %881 = vst [vmem:[#allocation3 + $0x8] sm:$0xff] %v879_v0 }
 0x443   :  { %1276 = shalt.err (!%p1273_p4)
}
 0x444   :  { %s1277_s17 = scalar_lea.hbm %s1634_s5, 256 }
 0x445   :  { %p1278_p5 = scmp.ne.s32.totalorder %s1634_s5, %s1277_s17  ;;  %p1281_p6 = scmp.lt.u32.totalorder %s1277_s17, %s1634_s5 }
 0x447   :  { %p1283_p7 = pnand %p1281_p6, %p1278_p5 }
 0x449   :  { %1286 = shalt.err (!%p1283_p7)
}
 0x44a   :  { %s1296_s22 = smov 128   ;;  %s1297_s23 = smov 8  }
 0x44b   :  { %893 = dma.vmem_to_hbm [thread:$0]  %s888_s13, 256, %s1634_s5, [#allocation4], %s1296_s22, %s1296_s22, %s1297_s23  }
 0x44c   :  { %1287 = dma.done.wait [#allocation4], 256  }
 0x44d   :  { %1288 = vsyncadd [#allocation4], 4294967040 }
 0x44e   :  { %897 = vsyncpa [#allocation4], 1 }

</bundles_post_ra>
